<compile_context>
chip_gen: v7x
topology: tpu7x:2x2x1
jax: 0.10.0
libtpu: 0.0.40
codegen_flags: <defaults>
</compile_context>

<pallas_src>
import jax
import jax.numpy as jnp
from jax.experimental import pallas as pl
from jax.experimental.pallas import tpu as pltpu

# Batch-row alignment: 16 covers both bf16 (16,128) and f32 (8,128) tiling.
_ALIGN = 16


def _neuralnet_kernel(x_ref, w_ref, b_ref, o_ref):
    # x_ref: (TB, 784)  w_ref: (784, 10)  b_ref: (1, 10) f32  o_ref: (TB, 10) f32
    # Feed the MXU in the streamed dtype (bf16 x bf16 is single-pass); f32 acc.
    logits = jnp.dot(x_ref[...], w_ref[...],
                     preferred_element_type=jnp.float32)
    logits = logits + b_ref[...].astype(jnp.float32)  # (TB, 10), f32

    # Numerically-stable log_softmax along dim=1 (all math in f32).
    m = jnp.max(logits, axis=-1, keepdims=True)
    shifted = logits - m
    lse = jnp.log(jnp.sum(jnp.exp(shifted), axis=-1, keepdims=True))
    o_ref[...] = (shifted - lse).astype(o_ref.dtype)


def neuralnet_forward(x_img, w, b, *, block_b=2048, stream_dtype=jnp.bfloat16):
    """Forward pass of NeuralNet: flatten -> Linear(784, 10) -> log_softmax.

    x_img: [B, 1, 28, 28] (NCHW) or already-flat [B, 784].
    w: [784, 10] (transposed vs PyTorch), b: [10].

    block_b: batch-tile size (upper bound). Default 2048 is the safe sweet
      spot on v7x (double-buffered bf16 x tiles ~7 MiB incl. 784->896 lane
      padding, well inside the 32 MiB scoped limit set below). On v6e/v5e
      (128 MiB physical VMEM) callers may raise it to 4096-8192, bumping
      vmem_limit_bytes accordingly, to shave per-grid-step overhead.
    stream_dtype: dtype x and W are streamed in. bf16 (default) halves the
      dominant HBM read of x; pass None to keep exact f32 math.
    """
    x = x_img.reshape(x_img.shape[0], -1) if x_img.ndim > 2 else x_img
    B, F = x.shape
    O = w.shape[1]

    if stream_dtype is not None:
        x = x.astype(stream_dtype)
        w = w.astype(stream_dtype)
    b2 = b.reshape(1, O).astype(jnp.float32)

    # Pad the batch to a multiple of _ALIGN so the block shape is layout-legal;
    # padded rows (zeros) produce finite log-softmax and get sliced off below.
    B_pad = max(_ALIGN, ((B + _ALIGN - 1) // _ALIGN) * _ALIGN)
    if B_pad != B:
        x = jnp.pad(x, ((0, B_pad - B), (0, 0)))

    # Batch tile: cap at ~B_pad/2 so the grid has >= 2 steps whenever the
    # batch allows it (lets the "parallel" axis shard over v7x's 2 TCs).
    half = max(_ALIGN, ((B_pad // 2) // _ALIGN) * _ALIGN)
    TB = max(_ALIGN, min(block_b, half))
    TB = (TB // _ALIGN) * _ALIGN

    grid = (pl.cdiv(B_pad, TB),)

    cost = pl.CostEstimate(
        flops=2 * B_pad * F * O,
        transcendentals=B_pad * (O + 1),  # exp per logit + log per row
        bytes_accessed=(B_pad * F * x.dtype.itemsize
                        + F * O * w.dtype.itemsize
                        + B_pad * O * 4),
    )

    out = pl.pallas_call(
        _neuralnet_kernel,
        out_shape=jax.ShapeDtypeStruct((B_pad, O), jnp.float32),
        grid=grid,
        in_specs=[
            # x: streamed tile-by-tile over the batch axis (auto-pipelined).
            pl.BlockSpec((TB, F), lambda i: (i, 0)),
            # W and b: same block every step -> stay resident in VMEM.
            pl.BlockSpec((F, O), lambda i: (0, 0)),
            pl.BlockSpec((1, O), lambda i: (0, 0)),
        ],
        out_specs=pl.BlockSpec((TB, O), lambda i: (i, 0)),
        compiler_params=pltpu.CompilerParams(
            # Rows are independent -> parallel batch axis.
            dimension_semantics=("parallel",),
            # Explicit limit: headroom over v5e's 16 MiB default scoped VMEM,
            # still safely <= v7x's 64 MiB physical per-TC VMEM.
            vmem_limit_bytes=32 << 20,
        ),
        cost_estimate=cost,
    )(x, w, b2)

    return out[:B]


def init_params(key):
    """Deterministic init matching nn.Linear(784, 10) shapes.

    PyTorch default: U(-1/sqrt(in_features), +1/sqrt(in_features)).
    Weight stored transposed ([784, 10]) for the kernel's x @ W layout.
    """
    k_w, k_b = jax.random.split(key)
    bound = 1.0 / jnp.sqrt(784.0)
    w = jax.random.uniform(k_w, (784, 10), jnp.float32, -bound, bound)
    b = jax.random.uniform(k_b, (10,), jnp.float32, -bound, bound)
    return w, b


if __name__ == "__main__":
    key = jax.random.PRNGKey(0)
    k_x, k_p = jax.random.split(key)

    # Small MNIST-like batch: NCHW [2, 1, 28, 28] -> flatten -> 784 features
    x = jax.random.normal(k_x, (2, 1, 28, 28), dtype=jnp.float32)
    w, b = init_params(k_p)
    x_flat = x.reshape(x.shape[0], -1)

    # Default (bf16-streamed) path.
    out = jax.block_until_ready(neuralnet_forward(x, w, b))
    assert out.shape == (2, 10)
    ref_bf16 = jax.nn.log_softmax(
        jnp.dot(x_flat.astype(jnp.bfloat16), w.astype(jnp.bfloat16),
                preferred_element_type=jnp.float32) + b, axis=-1)
    ref_f32 = jax.nn.log_softmax(x_flat @ w + b, axis=-1)
    assert jnp.allclose(out, ref_bf16, atol=2e-3, rtol=2e-3), "mismatch vs bf16 reference"
    assert jnp.allclose(out, ref_f32, atol=5e-2, rtol=5e-2), "mismatch vs f32 reference (loose)"

    # Exact-f32 path preserves the original module's numerics tightly.
    out_f32 = jax.block_until_ready(neuralnet_forward(x, w, b, stream_dtype=None))
    assert jnp.allclose(out_f32, ref_f32, atol=1e-4), "mismatch vs f32 reference (exact path)"

    # Ragged batch that is not a multiple of the tile / alignment size, with a
    # small tile so the multi-step (>=2) grid path is exercised.
    x_big = jax.random.normal(k_x, (37, 1, 28, 28), dtype=jnp.float32)
    out_big = jax.block_until_ready(neuralnet_forward(x_big, w, b, block_b=16))
    ref_big = jax.nn.log_softmax(
        jnp.dot(x_big.reshape(37, -1).astype(jnp.bfloat16), w.astype(jnp.bfloat16),
                preferred_element_type=jnp.float32) + b, axis=-1)
    assert out_big.shape == (37, 10)
    assert jnp.allclose(out_big, ref_big, atol=2e-3, rtol=2e-3), "mismatch vs reference (ragged batch)"

    print("KERNEL_OK")
</pallas_src>

<mosaic_0001>
module attributes {stable_mosaic.version = 11 : i64} {
  func.func @_neuralnet_kernel(%arg0: i32, %arg1: memref<16x784xbf16, #tpu.memory_space<vmem>>, %arg2: memref<784x10xbf16, #tpu.memory_space<vmem>>, %arg3: memref<1x10xf32, #tpu.memory_space<vmem>>, %arg4: memref<16x10xf32, #tpu.memory_space<vmem>>) attributes {dimension_semantics = [#tpu.dimension_semantics<parallel>], iteration_bounds = array<i64: 1>, scalar_prefetch = 0 : i64, scratch_operands = 0 : i64, tpu.core_type = #tpu.core_type<tc>, window_params = [{transform_indices = @transform_0, window_bounds = array<i64: 16, 784>}, {pipeline_mode = #tpu.pipeline_mode<synchronous>, transform_indices = @transform_1, window_bounds = array<i64: 784, 10>}, {pipeline_mode = #tpu.pipeline_mode<synchronous>, transform_indices = @transform_2, window_bounds = array<i64: 1, 10>}, {transform_indices = @transform_3, window_bounds = array<i64: 16, 10>}]} {
    %c0 = arith.constant 0 : index
    %c0_0 = arith.constant 0 : index
    %0 = vector.load %arg1[%c0, %c0_0] : memref<16x784xbf16, #tpu.memory_space<vmem>>, vector<16x784xbf16>
    %c0_1 = arith.constant 0 : index
    %c0_2 = arith.constant 0 : index
    %1 = vector.load %arg2[%c0_1, %c0_2] : memref<784x10xbf16, #tpu.memory_space<vmem>>, vector<784x10xbf16>
    %cst = arith.constant dense<0.000000e+00> : vector<16x10xf32>
    %2 = tpu.matmul %0, %1, %cst {dimension_numbers = #tpu.dot_dimension_numbers<[1], [0], [0], [1], [0, 0, 1, 1], [], []>} : vector<16x784xbf16>, vector<784x10xbf16>, vector<16x10xf32> -> vector<16x10xf32>
    %c0_3 = arith.constant 0 : index
    %c0_4 = arith.constant 0 : index
    %3 = vector.load %arg3[%c0_3, %c0_4] : memref<1x10xf32, #tpu.memory_space<vmem>>, vector<1x10xf32>
    %4 = vector.broadcast %3 : vector<1x10xf32> to vector<16x10xf32>
    %5 = arith.addf %2, %4 : vector<16x10xf32>
    %cst_5 = arith.constant dense<0xFF800000> : vector<16xf32>
    %6 = vector.multi_reduction <maximumf>, %5, %cst_5 [1] : vector<16x10xf32> to vector<16xf32>
    %7 = vector.shape_cast %6 : vector<16xf32> to vector<16x1xf32>
    %8 = vector.broadcast %7 : vector<16x1xf32> to vector<16x10xf32>
    %9 = arith.subf %5, %8 : vector<16x10xf32>
    %10 = math.exp %9 : vector<16x10xf32>
    %cst_6 = arith.constant dense<0.000000e+00> : vector<16xf32>
    %11 = vector.multi_reduction <add>, %10, %cst_6 [1] : vector<16x10xf32> to vector<16xf32>
    %12 = vector.shape_cast %11 : vector<16xf32> to vector<16x1xf32>
    %13 = math.log %12 : vector<16x1xf32>
    %14 = vector.broadcast %13 : vector<16x1xf32> to vector<16x10xf32>
    %15 = arith.subf %9, %14 : vector<16x10xf32>
    %c0_7 = arith.constant 0 : index
    %c0_8 = arith.constant 0 : index
    %16 = vector.load %arg4[%c0_7, %c0_8] : memref<16x10xf32, #tpu.memory_space<vmem>>, vector<16x10xf32>
    tpu.vector_store %arg4[%c0_7, %c0_8], %15 {strides = array<i32>} : memref<16x10xf32, #tpu.memory_space<vmem>>, vector<16x10xf32>,
    return
  }
  func.func @transform_0(%arg0: i32) -> (i32, i32) {
    %c0_i32 = arith.constant 0 : i32
    %c0_i32_0 = arith.constant 0 : i32
    return %arg0, %c0_i32 : i32, i32
  }
  func.func @transform_1(%arg0: i32) -> (i32, i32) {
    %c0_i32 = arith.constant 0 : i32
    %c0_i32_0 = arith.constant 0 : i32
    %c0_i32_1 = arith.constant 0 : i32
    return %c0_i32, %c0_i32_0 : i32, i32
  }
  func.func @transform_2(%arg0: i32) -> (i32, i32) {
    %c0_i32 = arith.constant 0 : i32
    %c0_i32_0 = arith.constant 0 : i32
    %c0_i32_1 = arith.constant 0 : i32
    return %c0_i32, %c0_i32_0 : i32, i32
  }
  func.func @transform_3(%arg0: i32) -> (i32, i32) {
    %c0_i32 = arith.constant 0 : i32
    %c0_i32_0 = arith.constant 0 : i32
    return %arg0, %c0_i32 : i32, i32
  }
}

</mosaic_0001>

<bundles_post_ra>
// kernel: tpu_custom_call.1
= control target key start
LH: loop header
LB: loop body
LE: loop exit
PB: predicated region body
PF: predicated region fallthrough
CT: control target
= control target key end

     0   :  { %v897_v38 = vmov 0.0   ;;  %vm898_vm0 = vmmov 0   ;;  %vm458_vm1 = vcmask 130048   ;;  %s1111_s0 = inlined_call_operand.vmem [shape: bf16[16,784], index: 0, kind: input, shape index: {}]   ;;  %s1112_s1 = inlined_call_operand.vmem [shape: bf16[784,10], index: 1, kind: input, shape index: {}]   ;;  %s1113_s2 = inlined_call_operand.vmem [shape: f32[1,10], index: 2, kind: input, shape index: {}]   ;;  %s1114_s3 = inlined_call_operand.hbm [shape: f32[16,10], index: 3, kind: output, shape index: {}]  }
   0x1   :  { %v806_v0 = vld [vmem:[%s1112_s1 + $0x40] sm:$0xff]   ;;  %v810_v4 = vld [vmem:[%s1112_s1 + $0x48] sm:$0xff]   ;;  %v814_v8 = vld [vmem:[%s1112_s1 + $0x50] sm:$0xff]  }
   0x2   :  { %v807_v1 = vld [vmem:[%s1112_s1] sm:$0xff]   ;;  %727 = vmatprep.subr.bf16.mxu0 %v806_v0  ;;  %v811_v5 = vld [vmem:[%s1112_s1 + $0x8] sm:$0xff]   ;;  %v815_v9 = vld [vmem:[%s1112_s1 + $0x10] sm:$0xff]  }
   0x3   :  { %v808_v2 = vld [vmem:[%s1112_s1 + $0xc0] sm:$0xff]   ;;  %728 = vmatpush3.bf16.msra.mxu0 %v807_v1  ;;  %v812_v6 = vld [vmem:[%s1112_s1 + $0xc8] sm:$0xff]   ;;  %v816_v10 = vld [vmem:[%s1112_s1 + $0xd0] sm:$0xff]  }
   0x4   :  { %v809_v3 = vld [vmem:[%s1112_s1 + $0x80] sm:$0xff]   ;;  %749 = vmatprep.subr.bf16.mxu1 %v808_v2  ;;  %729 = vmatprep.subr.bf16.mxu0 %v810_v4  ;;  %v813_v7 = vld [vmem:[%s1112_s1 + $0x88] sm:$0xff]   ;;  %v817_v11 = vld [vmem:[%s1112_s1 + $0x90] sm:$0xff]  }
   0x5   :  { %750 = vmatpush3.bf16.msra.mxu1 %v809_v3  ;;  %v818_v12 = vld [vmem:[%s1112_s1 + $0x58] sm:$0xff]   ;;  %v822_v16 = vld [vmem:[%s1112_s1 + $0x60] sm:$0xff]   ;;  %v826_v20 = vld [vmem:[%s1112_s1 + $0x68] sm:$0xff]  }
   0x6   :  { %751 = vmatprep.subr.bf16.mxu1 %v812_v6  ;;  %v819_v13 = vld [vmem:[%s1112_s1 + $0x18] sm:$0xff]   ;;  %v823_v17 = vld [vmem:[%s1112_s1 + $0x20] sm:$0xff]   ;;  %v827_v21 = vld [vmem:[%s1112_s1 + $0x28] sm:$0xff]  }
   0x7   :  { %730 = vmatpush3.bf16.msra.mxu0 %v811_v5  ;;  %v820_v14 = vld [vmem:[%s1112_s1 + $0xd8] sm:$0xff]   ;;  %v824_v18 = vld [vmem:[%s1112_s1 + $0xe0] sm:$0xff]   ;;  %v828_v22 = vld [vmem:[%s1112_s1 + $0xe8] sm:$0xff]  }
   0x8   :  { %731 = vmatprep.subr.bf16.mxu0 %v814_v8  ;;  %v821_v15 = vld [vmem:[%s1112_s1 + $0x98] sm:$0xff]   ;;  %v825_v19 = vld [vmem:[%s1112_s1 + $0xa0] sm:$0xff]   ;;  %v829_v23 = vld [vmem:[%s1112_s1 + $0xa8] sm:$0xff]  }
   0x9   :  { %752 = vmatpush3.bf16.msra.mxu1 %v813_v7  ;;  %v830_v24 = vld [vmem:[%s1112_s1 + $0x70] sm:$0xff]   ;;  %v834_v28 = vld [vmem:[%s1112_s1 + $0x78] sm:$0xff]   ;;  %v839_v32 = vld [vmem:[%s1111_s0 + $0x4] ss:$28 sps:$4 sm:$0xff]  }
   0xa   :  { %753 = vmatprep.subr.bf16.mxu1 %v816_v10  ;;  %v831_v25 = vld [vmem:[%s1112_s1 + $0x30] sm:$0xff]   ;;  %v835_v29 = vld [vmem:[%s1112_s1 + $0x38] sm:$0xff]   ;;  %494 = vmatprep.mubr.bf16.mxu0 %v839_v32  ;;  %v841_v34 = vld [vmem:[%s1112_s1 + $0x140] sm:$0xff]  }
   0xb   :  { %732 = vmatpush3.bf16.msra.mxu0 %v815_v9  ;;  %v832_v26 = vld [vmem:[%s1112_s1 + $0xf0] sm:$0xff]   ;;  %v836_v30 = vld [vmem:[%s1112_s1 + $0xf8] sm:$0xff]   ;;  %v842_v35 = vld [vmem:[%s1111_s0 + $0x8] ss:$28 sps:$4 sm:$0xff]  }
   0xc   :  { %733 = vmatprep.subr.bf16.mxu0 %v818_v12  ;;  %v833_v27 = vld [vmem:[%s1112_s1 + $0xb0] sm:$0xff]   ;;  %v837_v31 = vld [vmem:[%s1111_s0] ss:$28 sps:$4 sm:$0xff]   ;;  %v844_v36 = vld [vmem:[%s1111_s0 + $0xc] ss:$28 sps:$4 sm:$0xff]  }
   0xd   :  { %754 = vmatpush3.bf16.msra.mxu1 %v817_v11  ;;  %v840_v33 = vld [vmem:[%s1112_s1 + $0xb8] sm:$0xff]   ;;  %v845_v37 = vld [vmem:[%s1112_s1 + $0x100] sm:$0xff]   ;;  %535 = vmatprep.mubr.bf16.mxu1 %v844_v36  ;;  %v846_v39 = vld [vmem:[%s1112_s1 + $0x148] sm:$0xff]  }
   0xe   :  { %755 = vmatprep.subr.bf16.mxu1 %v820_v14  ;;  %v847_v40 = vld [vmem:[%s1112_s1 + $0x108] sm:$0xff]   ;;  %v848_v41 = vld [vmem:[%s1112_s1 + $0x150] sm:$0xff]   ;;  %v850_v43 = vld [vmem:[%s1112_s1 + $0x158] sm:$0xff]  }
   0xf   :  { %734 = vmatpush3.bf16.msra.mxu0 %v819_v13  ;;  %v849_v42 = vld [vmem:[%s1112_s1 + $0x110] sm:$0xff]   ;;  %v851_v44 = vld [vmem:[%s1112_s1 + $0x118] sm:$0xff]   ;;  %v852_v45 = vld [vmem:[%s1112_s1 + $0x160] sm:$0xff]  }
  0x10   :  { %735 = vmatprep.subr.bf16.mxu0 %v822_v16  ;;  %v853_v46 = vld [vmem:[%s1112_s1 + $0x120] sm:$0xff]   ;;  %v854_v47 = vld [vmem:[%s1112_s1 + $0x168] sm:$0xff]   ;;  %v863_v49 = vld [vmem:[%s1111_s0 + $0x14] ss:$28 sps:$4 sm:$0xff]  }
  0x11   :  { %756 = vmatpush3.bf16.msra.mxu1 %v821_v15  ;;  %v860_v48 = vld [vmem:[%s1112_s1 + $0x180] sm:$0xff]   ;;  %v864_v50 = vld [vmem:[%s1111_s0 + $0x18] ss:$28 sps:$4 sm:$0xff]   ;;  %v855_v51 = vld [vmem:[%s1112_s1 + $0x128] sm:$0xff]  }
  0x12   :  { %757 = vmatprep.subr.bf16.mxu1 %v824_v18 }
  0x13   :  { %736 = vmatpush3.bf16.msra.mxu0 %v823_v17 }
  0x14   :  { %737 = vmatprep.subr.bf16.mxu0 %v826_v20 }
  0x15   :  { %758 = vmatpush3.bf16.msra.mxu1 %v825_v19 }
  0x16   :  { %759 = vmatprep.subr.bf16.mxu1 %v828_v22 }
  0x17   :  { %738 = vmatpush3.bf16.msra.mxu0 %v827_v21 }
  0x18   :  { %739 = vmatprep.subr.bf16.mxu0 %v830_v24 }
  0x19   :  { %760 = vmatpush3.bf16.msra.mxu1 %v829_v23 }
  0x1a   :  { %761 = vmatprep.subr.bf16.mxu1 %v832_v26 }
  0x1b   :  { %740 = vmatpush3.bf16.msra.mxu0 %v831_v25 }
  0x1c   :  { %741 = vmatprep.subr.bf16.mxu0 %v834_v28 }
  0x1d   :  { %762 = vmatpush3.bf16.msra.mxu1 %v833_v27 }
  0x1e   :  { %763 = vmatprep.subr.bf16.mxu1 %v836_v30 }
  0x1f   :  { %742 = vmatpush3.bf16.msra.mxu0 %v835_v29 }
  0x20   :  { %771 = vmatprep.subr.bf16.mxu0 %v841_v34 }
  0x21   :  { %764 = vmatpush3.bf16.msra.mxu1 %v840_v33 }
  0x22   :  { %495 = vmatmul.mubr.bf16.vlgmr.msra.gmra.mrb[0].mxu0 %v837_v31  ;;  %795 = vmatprep.subr.bf16.mxu1 %v897_v38 }
  0x23   :  { %772 = vmatpush3.bf16.msra.mxu0 %v845_v37  ;;  %576 = vmatprep.mubr.bf16.mxu0 %v863_v49 }
  0x24   :  { %536 = vmatmul.mubr.bf16.vlgmr.msra.gmra.mrb[0].mxu1 %v842_v35  ;;  %773 = vmatprep.subr.bf16.mxu0 %v846_v39 }
  0x25   :  { %797 = vmatprep.mubr.msk.bf16.mxu1 %vm898_vm0, %v897_v38  ;;  %796 = vmatpush3.bf16.msra.mxu1 %v860_v48 }
  0x27   :  { %774 = vmatpush3.bf16.msra.mxu0 %v847_v40 }
  0x28   :  { %775 = vmatprep.subr.bf16.mxu0 %v848_v41 }
  0x2b   :  { %776 = vmatpush3.bf16.msra.mxu0 %v849_v42 }
  0x2c   :  { %777 = vmatprep.subr.bf16.mxu0 %v850_v43 }
  0x2f   :  { %778 = vmatpush3.bf16.msra.mxu0 %v851_v44 }
  0x30   :  { %779 = vmatprep.subr.bf16.mxu0 %v852_v45 }
  0x33   :  { %780 = vmatpush3.bf16.msra.mxu0 %v853_v46 }
  0x34   :  { %8 = vsyncpa [#allocation3], 0  ;;  %781 = vmatprep.subr.bf16.mxu0 %v854_v47  ;;  %v856_v52 = vld [vmem:[%s1112_s1 + $0x170] sm:$0xff]   ;;  %798 = vmatmul.mubr.msk.bf16.vlgmr.msra.gmra.mrb[4].mxu1 %vm458_vm1, %v864_v50  ;;  %v858_v54 = vld [vmem:[%s1112_s1 + $0x178] sm:$0xff]   ;;  %vm626_vm2 = vcmask 80896  }
  0x35   :  { %v857_v53 = vld [vmem:[%s1112_s1 + $0x130] sm:$0xff]   ;;  %v859_v55 = vld [vmem:[%s1112_s1 + $0x138] sm:$0xff]   ;;  %v669_v58 = vld [vmem:[%s1113_s2] ss:$0 sm:$0xff] }
  0x36   :  { %v861_v56 = vld [vmem:[%s1111_s0 + $0x10] ss:$28 sps:$4 sm:$0xff]   ;;  %s899_s0 = smov [#allocation2]  }
  0x37   :  { %782 = vmatpush3.bf16.msra.mxu0 %v855_v51  ;;  %s658_s1 = sshll.u32 %s899_s0, 4  ;;  %s659_s1 = int_to_ptr.vmem [resolvable:$true] %s658_s1 }
  0x38   :  { %783 = vmatprep.subr.bf16.mxu0 %v856_v52  ;;  %s873_s2 = scalar_lea.vmem %s659_s1, 256  ;;  %p878_p1 = scmp.lt.s32.totalorder %s659_s1, %s659_s1 }
  0x39   :  { %p874_p0 = scmp.ne.s32.totalorder %s659_s1, %s873_s2  ;;  %p879_p2 = scmp.lt.s32.totalorder %s873_s2, %s873_s2 }
  0x3b   :  { %784 = vmatpush3.bf16.msra.mxu0 %v857_v53  ;;  %p880_p3 = por %p879_p2, %p878_p1 }
  0x3c   :  { %785 = vmatprep.subr.bf16.mxu0 %v858_v54 }
  0x3d   :  { %p881_p4 = pnand %p880_p3, %p874_p0 }
  0x3f   :  { %786 = vmatpush3.bf16.msra.mxu0 %v859_v55 }
  0x42   :  { %577 = vmatmul.mubr.bf16.vlgmr.msra.gmra.mrb[4].mxu0 %v861_v56 }
  0xf5   :  { %v743_v57 = vpop.f32.mrb[0].mxu0 }
  0xf6   :  { %v744_v59 = vpop.f32.mrb[1].mxu0 }
  0xf7   :  { %v745_v60 = vadd.f32 %v744_v59, %v743_v57  ;;  %v746_v61 = vpop.f32.mrb[2].mxu0  ;;  %v765_v62 = vpop.f32.mrb[0].mxu1 }
  0xf8   :  { %v747_v63 = vpop.f32.mrb[3].mxu0  ;;  %v766_v2 = vpop.f32.mrb[1].mxu1 }
  0xf9   :  { %v497_v0 = vadd.f32 %v745_v60, %v669_v58  ;;  %v748_v1 = vadd.f32 %v747_v63, %v746_v61  ;;  %v767_v3 = vadd.f32 %v766_v2, %v765_v62  ;;  %v768_v4 = vpop.f32.mrb[2].mxu1 }
  0xfa   :  { %v769_v6 = vpop.f32.mrb[3].mxu1 }
  0xfb   :  { %v500_v5 = vadd.f32 %v748_v1, %v669_v58  ;;  %v538_v7 = vadd.f32 %v767_v3, %v497_v0  ;;  %v770_v8 = vadd.f32 %v769_v6, %v768_v4 }
  0xfd   :  { %v541_v9 = vadd.f32 %v770_v8, %v500_v5 }
 0x107   :  { %v619_v10 = vpop.f32.mrb[4].mxu1 }
 0x108   :  { %v799_v11 = vpop.f32.mrb[5].mxu1 }
 0x109   :  { %v622_v12 = vpop.f32.mrb[6].mxu1 }
 0x10a   :  { %v800_v13 = vpop.f32.mrb[7].mxu1 }
 0x115   :  { %v787_v14 = vpop.f32.mrb[4].mxu0 }
 0x116   :  { %v788_v15 = vpop.f32.mrb[5].mxu0 }
 0x117   :  { %v789_v16 = vadd.f32 %v788_v15, %v787_v14  ;;  %v790_v17 = vpop.f32.mrb[6].mxu0 }
 0x118   :  { %v791_v18 = vpop.f32.mrb[7].mxu0 }
 0x119   :  { %v579_v19 = vadd.f32 %v789_v16, %v538_v7  ;;  %v792_v20 = vadd.f32 %v791_v18, %v790_v17 }
 0x11b   :  { %v620_v21 = vadd.f32 %v619_v10, %v579_v19  ;;  %v582_v22 = vadd.f32 %v792_v20, %v541_v9 }
 0x11d   :  { %v623_v23 = vadd.f32 %v622_v12, %v582_v22  ;;  %v627_v24 = vsel %vm626_vm2, %v620_v21, -inf }
 0x11e   :  { %628 = vmax.xlane.f32.xlu0 %v627_v24 }
 0x11f   :  { %v630_v25 = vsel %vm626_vm2, %v623_v23, -inf }
 0x122   :  { %631 = vmax.xlane.f32.xlu0 %v630_v25 }
 0x1ab   :  { %v629_v26 = vpop.xlane.xlu0 %628 }
 0x1ac   :  { %v633_v27 = vsub.f32 %v620_v21, %v629_v26 }
 0x1ae   :  { %v635_v28 = vmul.f32 1.442695, %v633_v27 }
 0x1af   :  { %v632_v29 = vpop.xlane.xlu0 %631 }
 0x1b0   :  { %865 = vpow2.f32 %v635_v28  ;;  %v634_v30 = vsub.f32 %v623_v23, %v632_v29 }
 0x1b2   :  { %v637_v31 = vmul.f32 1.442695, %v634_v30 }
 0x1b4   :  { %867 = vpow2.f32 %v637_v31 }
 0x1ba   :  { %v866_v32 = vpop.eup %865 }
 0x1bb   :  { %v639_v33 = vsel %vm626_vm2, %v866_v32, 0.0 }
 0x1bc   :  { %640 = vadd.xlane.f32.xlu1 %v639_v33 }
 0x1be   :  { %v868_v34 = vpop.eup %867 }
 0x1bf   :  { %v642_v35 = vsel %vm626_vm2, %v868_v34, 0.0 }
 0x1c0   :  { %643 = vadd.xlane.f32.xlu1 %v642_v35 }
 0x249   :  { %v641_v36 = vpop.xlane.xlu1 %640 }
 0x24a   :  { %869 = vlog2.f32 %v641_v36 }
 0x24d   :  { %v644_v37 = vpop.xlane.xlu1 %643 }
 0x24e   :  { %871 = vlog2.f32 %v644_v37 }
 0x254   :  { %v870_v38 = vpop.eup %869 }
 0x255   :  { %v646_v39 = vmul.f32 0.6931472, %v870_v38 }
 0x257   :  { %v649_v40 = vsub.f32 %v633_v27, %v646_v39 }
 0x258   :  { %v872_v41 = vpop.eup %871 }
 0x259   :  { %651 = vst.msk [vmem:[#allocation2] sm:$0xff] %vm626_vm2, %v649_v40  ;;  %v648_v42 = vmul.f32 0.6931472, %v872_v41 }
 0x25b   :  { %v650_v43 = vsub.f32 %v634_v30, %v648_v42 }
 0x25d   :  { %652 = vst.msk [vmem:[#allocation2 + $0x8] sm:$0xff] %vm626_vm2, %v650_v43 }
 0x25e   :  { %884 = shalt.err (!%p881_p4)
}
 0x25f   :  { %s885_s20 = scalar_lea.hbm %s1114_s3, 256 }
 0x260   :  { %p886_p5 = scmp.ne.s32.totalorder %s1114_s3, %s885_s20  ;;  %p889_p6 = scmp.lt.u32.totalorder %s885_s20, %s1114_s3 }
 0x262   :  { %p891_p7 = pnand %p889_p6, %p886_p5 }
 0x264   :  { %894 = shalt.err (!%p891_p7)
}
 0x265   :  { %s900_s25 = smov 128   ;;  %s901_s26 = smov 8  }
 0x266   :  { %664 = dma.vmem_to_hbm [thread:$0]  %s659_s1, 256, %s1114_s3, [#allocation3], %s900_s25, %s900_s25, %s901_s26  }
 0x267   :  { %895 = dma.done.wait [#allocation3], 256  }
 0x268   :  { %896 = vsyncadd [#allocation3], 4294967040 }
 0x269   :  { %668 = vsyncpa [#allocation3], 1 }

</bundles_post_ra>
